<compile_context>
chip_gen: v7x
topology: tpu7x:2x2x1
jax: 0.10.0
libtpu: 0.0.40
codegen_flags: <defaults>
</compile_context>

<pallas_src>
import jax
import jax.numpy as jnp
from jax.experimental import pallas as pl
from jax.experimental.pallas import tpu as pltpu


# ---------------------------------------------------------------------------
# Fused kernel: stacked distant-CE + mean-CE (+ mask-sum ratio) -> scalar.
# ---------------------------------------------------------------------------
def _criterion_loss_kernel(span_logits_ref, span_pos_ref, ac_logits_ref,
                           labels_ref, mask_sum_ref, out_ref):
    f32 = jnp.float32

    # ---- ae_loss: distant cross-entropy over stacked [start; end] rows ----
    logits = span_logits_ref[...].astype(f32)                    # (2B, S)
    pos = span_pos_ref[...].astype(f32)                          # (2B, S)
    m = jnp.max(logits, axis=-1, keepdims=True)
    shifted = logits - m
    lse = jnp.log(jnp.sum(jnp.exp(shifted), axis=-1, keepdims=True))
    log_probs = shifted - lse                                    # (2B, S)
    num = jnp.sum(pos * log_probs, axis=-1, keepdims=True)       # (2B, 1)
    den = jnp.sum(pos, axis=-1, keepdims=True)                   # (2B, 1)
    # NOTE: same precondition as the PyTorch reference — every row must have
    # at least one positive position (den > 0), otherwise Inf/NaN.
    per_row = num * pl.reciprocal(den, approx=True)              # (2B, 1)
    # (start_loss + end_loss) / 2 == -mean over the 2B stacked rows.
    ae_loss = -jnp.mean(per_row, keepdims=True)                  # (1, 1)

    # ---- ac_loss: nn.CrossEntropyLoss(reduction='mean') ----
    # TODO(synk): ignore_index=-100 / class weights of nn.CrossEntropyLoss
    # are not implemented; labels are assumed valid class indices.
    ac = ac_logits_ref[...].astype(f32)                          # (N, C)
    n, c = ac.shape
    m2 = jnp.max(ac, axis=-1, keepdims=True)
    sh2 = ac - m2
    lse2 = jnp.log(jnp.sum(jnp.exp(sh2), axis=-1, keepdims=True))
    lp2 = sh2 - lse2                                             # (N, C)
    labels = labels_ref[...].astype(jnp.int32)                   # (N, 1)
    classes = jax.lax.broadcasted_iota(jnp.int32, (n, c), 1)     # (N, C)
    onehot = (classes == labels).astype(f32)
    nll = -jnp.sum(onehot * lp2, axis=-1, keepdims=True)         # (N, 1)
    ac_scalar = jnp.mean(nll, keepdims=True)                     # (1, 1)

    # sum(mask * ac_scalar) / sum(mask) == ac_scalar * s / s  (NaN if s == 0)
    s = mask_sum_ref[0]                                          # f32 scalar (SMEM)
    ac_loss = (ac_scalar * s) / s                                # (1, 1)

    out_ref[...] = ae_loss + ac_loss


# ---------------------------------------------------------------------------
# Wrapper: one no-grid pallas_call, full-array VMEM blocks, SMEM scalar in.
# ---------------------------------------------------------------------------
def criterion_loss(start_logits, start_positions, end_logits, end_positions,
                   ac_logits, flat_polarity_labels, flat_label_masks):
    # Stack start/end into single blocks (cuts input DMAs 7 -> 5 and halves
    # the in-kernel softmax/reduction work).  No dtype casts here: the kernel
    # upcasts after the VMEM load.
    span_logits = jnp.concatenate([start_logits, end_logits], axis=0)
    span_positions = jnp.concatenate([start_positions, end_positions], axis=0)
    n = ac_logits.shape[0]
    labels = flat_polarity_labels.reshape(n, 1)
    # Only sum(mask) matters; ship it as one SMEM f32 scalar.
    mask_sum = jnp.sum(flat_label_masks, dtype=jnp.float32).reshape(1)

    args = (span_logits, span_positions, ac_logits, labels, mask_sum)

    elems = int(span_logits.size) + int(ac_logits.size)
    bytes_accessed = sum(int(a.size) * a.dtype.itemsize for a in args) + 4
    cost = pl.CostEstimate(
        flops=8 * elems,
        transcendentals=elems + 2 * (int(span_logits.shape[0]) + n),
        bytes_accessed=int(bytes_accessed),
    )

    vmem = pltpu.MemorySpace.VMEM
    smem = pltpu.MemorySpace.SMEM
    out = pl.pallas_call(
        _criterion_loss_kernel,
        out_shape=jax.ShapeDtypeStruct((1, 1), jnp.float32),
        in_specs=[
            pl.BlockSpec(memory_space=vmem),   # span_logits   (2B, S)
            pl.BlockSpec(memory_space=vmem),   # span_positions(2B, S)
            pl.BlockSpec(memory_space=vmem),   # ac_logits     (N, C)
            pl.BlockSpec(memory_space=vmem),   # labels        (N, 1)
            pl.BlockSpec(memory_space=smem),   # sum(mask)     (1,)
        ],
        out_specs=pl.BlockSpec(memory_space=vmem),
        cost_estimate=cost,
    )(*args)
    return out[0, 0]


# ---------------------------------------------------------------------------
# Pure-JAX reference for correctness checking.
# ---------------------------------------------------------------------------
def _reference_loss(start_logits, start_positions, end_logits, end_positions,
                    ac_logits, labels, mask):
    def distant_ce(logits, positions):
        lp = jax.nn.log_softmax(logits.astype(jnp.float32), axis=-1)
        pos = positions.astype(jnp.float32)
        return -jnp.mean(jnp.sum(pos * lp, axis=-1) / jnp.sum(pos, axis=-1))

    ae = 0.5 * (distant_ce(start_logits, start_positions)
                + distant_ce(end_logits, end_positions))
    lp = jax.nn.log_softmax(ac_logits.astype(jnp.float32), axis=-1)
    nll = -jnp.take_along_axis(lp, labels[:, None], axis=-1)[:, 0]
    ac_scalar = jnp.mean(nll)
    ac = jnp.sum(mask * ac_scalar) / jnp.sum(mask)
    return ae + ac


if __name__ == "__main__":
    key = jax.random.PRNGKey(0)
    ks = jax.random.split(key, 8)

    B, S = 2, 128        # batch, sequence length (start/end span logits)
    N, C = 8, 4          # flattened aspect terms, polarity classes

    # Model-native dtypes: bf16 logits, f32 position masks, int32 labels.
    start_logits = jax.random.normal(ks[0], (B, S), jnp.bfloat16)
    end_logits = jax.random.normal(ks[1], (B, S), jnp.bfloat16)

    # Multi-hot position targets with at least one hit per row.
    start_positions = (jax.random.uniform(ks[2], (B, S)) < 0.05).astype(jnp.float32)
    start_positions = start_positions.at[:, 0].set(1.0)
    end_positions = (jax.random.uniform(ks[3], (B, S)) < 0.05).astype(jnp.float32)
    end_positions = end_positions.at[:, 1].set(1.0)

    ac_logits = jax.random.normal(ks[4], (N, C), jnp.bfloat16)
    flat_polarity_labels = jax.random.randint(ks[5], (N,), 0, C, jnp.int32)
    flat_label_masks = (jax.random.uniform(ks[6], (N,)) < 0.5).astype(jnp.float32)
    flat_label_masks = flat_label_masks.at[0].set(1.0)   # ensure sum(mask) > 0

    loss_fn = jax.jit(criterion_loss)
    loss = loss_fn(start_logits, start_positions, end_logits, end_positions,
                   ac_logits, flat_polarity_labels, flat_label_masks)
    jax.block_until_ready(loss)

    ref = _reference_loss(start_logits, start_positions, end_logits,
                          end_positions, ac_logits, flat_polarity_labels,
                          flat_label_masks)

    assert loss.shape == ()
    assert bool(jnp.isfinite(loss))
    # Tolerance covers the EUP approximate reciprocal used for 1/sum(pos).
    assert bool(jnp.abs(loss - ref) <= 5e-3 * (1.0 + jnp.abs(ref))), (loss, ref)
    print("KERNEL_OK")
</pallas_src>

<mosaic_0001>
module attributes {stable_mosaic.version = 11 : i64} {
  func.func @_criterion_loss_kernel(%arg0: memref<4x128xbf16, #tpu.memory_space<vmem>>, %arg1: memref<4x128xf32, #tpu.memory_space<vmem>>, %arg2: memref<8x4xbf16, #tpu.memory_space<vmem>>, %arg3: memref<8x1xi32, #tpu.memory_space<vmem>>, %arg4: memref<1xf32, #tpu.memory_space<smem>>, %arg5: memref<1x1xf32, #tpu.memory_space<vmem>>) attributes {dimension_semantics = [], scalar_prefetch = 0 : i64, scratch_operands = 0 : i64, tpu.core_type = #tpu.core_type<tc>} {
    %c0 = arith.constant 0 : index
    %c0_0 = arith.constant 0 : index
    %0 = vector.load %arg0[%c0, %c0_0] : memref<4x128xbf16, #tpu.memory_space<vmem>>, vector<4x128xbf16>
    %1 = arith.extf %0 : vector<4x128xbf16> to vector<4x128xf32>
    %c0_1 = arith.constant 0 : index
    %c0_2 = arith.constant 0 : index
    %2 = vector.load %arg1[%c0_1, %c0_2] : memref<4x128xf32, #tpu.memory_space<vmem>>, vector<4x128xf32>
    %cst = arith.constant dense<0xFF800000> : vector<4xf32>
    %3 = vector.multi_reduction <maximumf>, %1, %cst [1] : vector<4x128xf32> to vector<4xf32>
    %4 = vector.shape_cast %3 : vector<4xf32> to vector<4x1xf32>
    %5 = vector.broadcast %4 : vector<4x1xf32> to vector<4x128xf32>
    %6 = arith.subf %1, %5 : vector<4x128xf32>
    %7 = math.exp %6 : vector<4x128xf32>
    %cst_3 = arith.constant dense<0.000000e+00> : vector<4xf32>
    %8 = vector.multi_reduction <add>, %7, %cst_3 [1] : vector<4x128xf32> to vector<4xf32>
    %9 = vector.shape_cast %8 : vector<4xf32> to vector<4x1xf32>
    %10 = math.log %9 : vector<4x1xf32>
    %11 = vector.broadcast %10 : vector<4x1xf32> to vector<4x128xf32>
    %12 = arith.subf %6, %11 : vector<4x128xf32>
    %13 = arith.mulf %2, %12 : vector<4x128xf32>
    %cst_4 = arith.constant dense<0.000000e+00> : vector<4xf32>
    %14 = vector.multi_reduction <add>, %13, %cst_4 [1] : vector<4x128xf32> to vector<4xf32>
    %15 = vector.shape_cast %14 : vector<4xf32> to vector<4x1xf32>
    %cst_5 = arith.constant dense<0.000000e+00> : vector<4xf32>
    %16 = vector.multi_reduction <add>, %2, %cst_5 [1] : vector<4x128xf32> to vector<4xf32>
    %17 = vector.shape_cast %16 : vector<4xf32> to vector<4x1xf32>
    %18 = tpu.reciprocal %17 {approx = true} : vector<4x1xf32> -> vector<4x1xf32>
    %19 = arith.mulf %15, %18 : vector<4x1xf32>
    %20 = vector.shape_cast %19 : vector<4x1xf32> to vector<1x4x1xf32>
    %cst_6 = arith.constant dense<0.000000e+00> : vector<1xf32>
    %21 = vector.multi_reduction <add>, %20, %cst_6 [1, 2] : vector<1x4x1xf32> to vector<1xf32>
    %22 = vector.shape_cast %21 : vector<1xf32> to vector<1x1x1xf32>
    %23 = vector.extract %22[0, 0, 0] : f32 from vector<1x1x1xf32>
    %24 = vector.broadcast %23 : f32 to vector<1x1xf32>
    %cst_7 = arith.constant 4.000000e+00 : f32
    %25 = vector.broadcast %cst_7 : f32 to vector<1x1xf32>
    %26 = arith.divf %24, %25 : vector<1x1xf32>
    %cst_8 = arith.constant 0.000000e+00 : f32
    %27 = vector.broadcast %cst_8 : f32 to vector<1x1xf32>
    %28 = arith.subf %27, %26 : vector<1x1xf32>
    %c0_9 = arith.constant 0 : index
    %c0_10 = arith.constant 0 : index
    %29 = vector.load %arg2[%c0_9, %c0_10] : memref<8x4xbf16, #tpu.memory_space<vmem>>, vector<8x4xbf16>
    %30 = arith.extf %29 : vector<8x4xbf16> to vector<8x4xf32>
    %cst_11 = arith.constant dense<0xFF800000> : vector<8xf32>
    %31 = vector.multi_reduction <maximumf>, %30, %cst_11 [1] : vector<8x4xf32> to vector<8xf32>
    %32 = vector.shape_cast %31 : vector<8xf32> to vector<8x1xf32>
    %33 = vector.broadcast %32 : vector<8x1xf32> to vector<8x4xf32>
    %34 = arith.subf %30, %33 : vector<8x4xf32>
    %35 = math.exp %34 : vector<8x4xf32>
    %cst_12 = arith.constant dense<0.000000e+00> : vector<8xf32>
    %36 = vector.multi_reduction <add>, %35, %cst_12 [1] : vector<8x4xf32> to vector<8xf32>
    %37 = vector.shape_cast %36 : vector<8xf32> to vector<8x1xf32>
    %38 = math.log %37 : vector<8x1xf32>
    %39 = vector.broadcast %38 : vector<8x1xf32> to vector<8x4xf32>
    %40 = arith.subf %34, %39 : vector<8x4xf32>
    %c0_13 = arith.constant 0 : index
    %c0_14 = arith.constant 0 : index
    %41 = vector.load %arg3[%c0_13, %c0_14] : memref<8x1xi32, #tpu.memory_space<vmem>>, vector<8x1xi32>
    %42 = tpu.iota {dimensions = array<i32: 1>} : vector<8x4xi32>
    %43 = vector.broadcast %41 : vector<8x1xi32> to vector<8x4xi32>
    %44 = arith.cmpi eq, %42, %43 : vector<8x4xi32>
    %45 = arith.extui %44 : vector<8x4xi1> to vector<8x4xi32>
    %46 = arith.sitofp %45 : vector<8x4xi32> to vector<8x4xf32>
    %47 = arith.mulf %46, %40 : vector<8x4xf32>
    %cst_15 = arith.constant dense<0.000000e+00> : vector<8xf32>
    %48 = vector.multi_reduction <add>, %47, %cst_15 [1] : vector<8x4xf32> to vector<8xf32>
    %49 = vector.shape_cast %48 : vector<8xf32> to vector<8x1xf32>
    %cst_16 = arith.constant 0.000000e+00 : f32
    %50 = vector.broadcast %cst_16 : f32 to vector<8x1xf32>
    %51 = arith.subf %50, %49 : vector<8x1xf32>
    %52 = vector.shape_cast %51 : vector<8x1xf32> to vector<1x8x1xf32>
    %cst_17 = arith.constant dense<0.000000e+00> : vector<1xf32>
    %53 = vector.multi_reduction <add>, %52, %cst_17 [1, 2] : vector<1x8x1xf32> to vector<1xf32>
    %54 = vector.shape_cast %53 : vector<1xf32> to vector<1x1x1xf32>
    %55 = vector.extract %54[0, 0, 0] : f32 from vector<1x1x1xf32>
    %56 = vector.broadcast %55 : f32 to vector<1x1xf32>
    %cst_18 = arith.constant 8.000000e+00 : f32
    %57 = vector.broadcast %cst_18 : f32 to vector<1x1xf32>
    %58 = arith.divf %56, %57 : vector<1x1xf32>
    %c0_19 = arith.constant 0 : index
    %59 = memref.load %arg4[%c0_19] : memref<1xf32, #tpu.memory_space<smem>>
    %60 = vector.broadcast %59 : f32 to vector<1x1xf32>
    %61 = arith.mulf %58, %60 : vector<1x1xf32>
    %62 = vector.broadcast %59 : f32 to vector<1x1xf32>
    %63 = arith.divf %61, %62 : vector<1x1xf32>
    %64 = arith.addf %28, %63 : vector<1x1xf32>
    %c0_20 = arith.constant 0 : index
    %c0_21 = arith.constant 0 : index
    %65 = vector.load %arg5[%c0_20, %c0_21] : memref<1x1xf32, #tpu.memory_space<vmem>>, vector<1x1xf32>
    tpu.vector_store %arg5[%c0_20, %c0_21], %64 {strides = array<i32>} : memref<1x1xf32, #tpu.memory_space<vmem>>, vector<1x1xf32>,
    return
  }
}

</mosaic_0001>

<bundles_post_ra>
// kernel: criterion_loss.1
= control target key start
LH: loop header
LB: loop body
LE: loop exit
PB: predicated region body
PF: predicated region fallthrough
CT: control target
= control target key end

     0   :  { %vm25_vm0 = vcmask 1043456   ;;  %s239_s0 = inlined_call_operand.vmem [shape: bf16[4,128], index: 0, kind: input, shape index: {}]   ;;  %s240_s1 = inlined_call_operand.vmem [shape: f32[4,128], index: 1, kind: input, shape index: {}]   ;;  %s241_s2 = inlined_call_operand.vmem [shape: bf16[8,4], index: 2, kind: input, shape index: {}]   ;;  %s242_s3 = inlined_call_operand.vmem [shape: s32[8,1], index: 3, kind: input, shape index: {}]   ;;  %s243_s4 = inlined_call_operand.<no memory space> [shape: f32[1], index: 4, kind: input, shape index: {}]   ;;  %s244_s5 = inlined_call_operand.hbm [shape: f32[1,1], index: 5, kind: output, shape index: {}]  }
   0x1   :  { %v22_v0 = vld [vmem:[%s239_s0] sm:$0x3] }
   0x2   :  { %v62_v1 = vld [vmem:[%s241_s2] sm:$0xf]  ;;  %v23_v2 = vunpack.c.l.bf16 %v22_v0 }
   0x3   :  { %v63_v3 = vunpack.c.l.bf16 %v62_v1 }
   0x4   :  { %11 = vsyncpa [#allocation4], 0  ;;  %vm64_vm1 = vcmask 31744   ;;  %v26_v4 = vsel %vm25_vm0, %v23_v2, -inf  ;;  %v77_v6 = vld [vmem:[%s242_s3] sm:$0xff]  ;;  %v172_v7 = vmov 0   ;;  %v78_v22 = vlaneseq }
   0x5   :  { %27 = vmax.xlane.f32.xlu0 %v26_v4  ;;  %v65_v5 = vsel %vm64_vm1, %v63_v3, -inf  ;;  %v24_v18 = vld [vmem:[%s240_s1] sm:$0xf]  ;;  %v173_v31 = vmov 0.0   ;;  %vm47_vm3 = vcmask 3072   ;;  %vm91_vm4 = vcmask 7168  }
   0x6   :  { %135 = vset.pattern.permute.xlu0 %v172_v7  ;;  %v42_v19 = vsel %vm25_vm0, %v24_v18, 0.0  ;;  %v79_v23 = vand.u32 127, %v78_v22  ;;  %v106_v59 = vstv %s243_s4  ;;  %s174_s26 = smov [#allocation3]   ;;  %vm111_vm5 = vcmask 0  }
   0x7   :  { %s119_s27 = sshll.u32 %s174_s26, 4  ;;  %s120_s27 = int_to_ptr.vmem [resolvable:$true] %s119_s27 }
   0x8   :  { %s148_s28 = scalar_lea.vmem %s120_s27, 16  ;;  %s152_s4 = scalar_lea.vmem %s120_s27, 32 }
   0x9   :  { %66 = vmax.xlane.f32.xlu0 %v65_v5  ;;  %p149_p0 = scmp.ne.s32.totalorder %s120_s27, %s148_s28  ;;  %p153_p1 = scmp.lt.s32.totalorder %s120_s27, %s120_s27 }
   0xa   :  { %p154_p2 = scmp.lt.s32.totalorder %s152_s4, %s148_s28 }
   0xc   :  { %p155_p3 = por %p154_p2, %p153_p1 }
   0xe   :  { %p156_p4 = pnand %p155_p3, %p149_p0 }
  0x1f   :  { %81 = vperm.xlu0 %135, %v77_v6  }
  0x92   :  { %v28_v8 = vpop.xlane.xlu0 %27 }
  0x93   :  { %v29_v9 = vsub.f32 %v23_v2, %v28_v8 }
  0x95   :  { %v30_v10 = vmul.f32 1.442695, %v29_v9 }
  0x96   :  { %v67_v11 = vpop.xlane.xlu0 %66 }
  0x97   :  { %136 = vpow2.f32 %v30_v10  ;;  %v68_v12 = vsub.f32 %v63_v3, %v67_v11 }
  0x99   :  { %v69_v13 = vmul.f32 1.442695, %v68_v12 }
  0x9b   :  { %138 = vpow2.f32 %v69_v13 }
  0x9e   :  { %v82_v25 = vpop.permute.xlu0 %81 }
  0x9f   :  { %vm83_vm2 = vcmp.eq.s32.totalorder %v79_v23, %v82_v25 }
  0xa0   :  { %v127_v32 = vsel %vm83_vm2, 1.0, %v173_v31 }
  0xa1   :  { %v137_v14 = vpop.eup %136 }
  0xa2   :  { %v32_v15 = vsel %vm25_vm0, %v137_v14, 0.0 }
  0xa3   :  { %33 = vadd.xlane.f32.xlu1 %v32_v15 }
  0xa5   :  { %v139_v16 = vpop.eup %138 }
  0xa6   :  { %v71_v17 = vsel %vm64_vm1, %v139_v16, 0.0 }
  0xa7   :  { %72 = vadd.xlane.f32.xlu1 %v71_v17 }
  0xab   :  { %43 = vadd.xlane.f32.xlu1 %v42_v19 }
 0x130   :  { %v34_v20 = vpop.xlane.xlu1 %33 }
 0x131   :  { %140 = vlog2.f32 %v34_v20 }
 0x134   :  { %v73_v21 = vpop.xlane.xlu1 %72 }
 0x135   :  { %142 = vlog2.f32 %v73_v21 }
 0x138   :  { %v44_v37 = vpop.xlane.xlu1 %43 }
 0x139   :  { %144 = vrcp.f32 %v44_v37 }
 0x13a   :  { %146 = vrcp.f32 %v106_v59 }
 0x13b   :  { %v141_v24 = vpop.eup %140 }
 0x13c   :  { %v36_v26 = vmul.f32 0.6931472, %v141_v24 }
 0x13e   :  { %v37_v27 = vsub.f32 %v29_v9, %v36_v26 }
 0x13f   :  { %v143_v28 = vpop.eup %142 }
 0x140   :  { %v75_v29 = vmul.f32 0.6931472, %v143_v28  ;;  %v38_v30 = vmul.f32 %v37_v27, %v24_v18 }
 0x142   :  { %v39_v33 = vsel %vm25_vm0, %v38_v30, 0.0  ;;  %v76_v34 = vsub.f32 %v68_v12, %v75_v29 }
 0x143   :  { %40 = vadd.xlane.f32.xlu1 %v39_v33  ;;  %v145_v38 = vpop.eup %144 }
 0x144   :  { %v86_v35 = vmul.f32 %v127_v32, %v76_v34  ;;  %v147_v0 = vpop.eup %146 }
 0x146   :  { %v87_v36 = vsel %vm64_vm1, %v86_v35, 0.0 }
 0x147   :  { %88 = vadd.xlane.f32.xlu1 %v87_v36 }
 0x1d0   :  { %v41_v39 = vpop.xlane.xlu1 %40 }
 0x1d1   :  { %v46_v40 = vmul.f32 %v145_v38, %v41_v39 }
 0x1d3   :  { %v48_v41 = vsel %vm47_vm3, %v46_v40, 0.0 }
 0x1d4   :  { %49 = vadd.xlane.f32.xlu1 %v48_v41  ;;  %v89_v42 = vpop.xlane.xlu1 %88 }
 0x1d5   :  { %v90_v43 = vsub.f32 0.0, %v89_v42 }
 0x1d7   :  { %v92_v44 = vsel %vm91_vm4, %v90_v43, 0.0 }
 0x1d8   :  { %93 = vadd.xlane.f32.xlu1 %v92_v44 }
 0x261   :  { %v50_v45 = vpop.xlane.xlu1 %49 }
 0x262   :  { %v51_v46 = vrot.slane %v50_v45, 4 }
 0x264   :  { %v52_v47 = vadd.f32 %v51_v46, %v50_v45 }
 0x265   :  { %v94_v48 = vpop.xlane.xlu1 %93 }
 0x266   :  { %v53_v49 = vrot.slane %v52_v47, 2  ;;  %v95_v50 = vrot.slane %v94_v48, 4 }
 0x268   :  { %v96_v51 = vadd.f32 %v95_v50, %v94_v48  ;;  %v54_v52 = vadd.f32 %v53_v49, %v52_v47 }
 0x26a   :  { %v97_v53 = vrot.slane %v96_v51, 2  ;;  %v55_v54 = vrot.slane %v54_v52, 1 }
 0x26c   :  { %v98_v55 = vadd.f32 %v97_v53, %v96_v51  ;;  %v56_v56 = vadd.f32 %v55_v54, %v54_v52 }
 0x26e   :  { %128 = vpush %v56_v56  ;;  %v99_v57 = vrot.slane %v98_v55, 1 }
 0x270   :  { %v100_v58 = vadd.f32 %v99_v57, %v98_v55 }
 0x272   :  { %130 = vpush %v100_v58 }
 0x29f   :  { %s129_s24 = spop %128 }
 0x2a0   :  { %v58_v60 = vstv %s129_s24 }
 0x2a1   :  { %v60_v62 = vmul.f32 0.25, %v58_v60 }
 0x2a3   :  { %s131_s25 = spop %130  ;;  %v61_v2 = vsub.f32 0.0, %v60_v62 }
 0x2a4   :  { %v102_v61 = vstv %s131_s25 }
 0x2a5   :  { %v104_v63 = vmul.f32 0.125, %v102_v61 }
 0x2a7   :  { %v107_v1 = vmul.f32 %v106_v59, %v104_v63 }
 0x2a9   :  { %v109_v3 = vmul.f32 %v147_v0, %v107_v1 }
 0x2ab   :  { %v110_v4 = vadd.f32 %v109_v3, %v61_v2 }
 0x2ad   :  { %112 = vst.msk [vmem:[#allocation3] sm:$0x1] %vm111_vm5, %v110_v4 }
 0x2ae   :  { %159 = shalt.err (!%p156_p4)
}
 0x2af   :  { %s160_s6 = scalar_lea.hbm %s244_s5, 16 }
 0x2b0   :  { %p161_p5 = scmp.ne.s32.totalorder %s244_s5, %s160_s6  ;;  %p164_p6 = scmp.lt.u32.totalorder %s160_s6, %s244_s5 }
 0x2b2   :  { %p166_p7 = pnand %p164_p6, %p161_p5 }
 0x2b4   :  { %169 = shalt.err (!%p166_p7)
}
 0x2b5   :  { %122 = dma.vmem_to_hbm [thread:$0]  %s120_s27, 16, %s244_s5, [#allocation4]  }
 0x2b6   :  { %170 = dma.done.wait [#allocation4], 16  }
 0x2b7   :  { %171 = vsyncadd [#allocation4], 4294967280 }
 0x2b8   :  { %126 = vsyncpa [#allocation4], 1 }

</bundles_post_ra>
